<compile_context>
chip_gen: v5e
topology: v5e:2x2
jax: 0.10.0
libtpu: 0.0.40
codegen_flags: <defaults>
</compile_context>

<pallas_src>
import jax
import jax.numpy as jnp
from jax.experimental import pallas as pl
from jax.experimental.pallas import tpu as pltpu

LANE = 128          # lane / MXU granule (v5e / v6e / v7x)
SUBLANE_BF16 = 16   # bf16 sublane packing granule


def _round_up(x, m):
    return (x + m - 1) // m * m


def _mlp_kernel(x_ref, w1_ref, b1_ref, w2_ref, b2_ref, w3_ref, b3_ref, o_ref):
    # bf16 operands -> MXU with f32 accumulation; bias-add + ReLU on the VPU;
    # sigmoid's exp and reciprocal both land on the (otherwise idle) EUP slot.
    x = x_ref[...]                                                    # bf16 (TB, K)
    h1 = jnp.maximum(
        jnp.dot(x, w1_ref[...], preferred_element_type=jnp.float32) + b1_ref[...],
        0.0)
    h2 = jnp.maximum(
        jnp.dot(h1.astype(jnp.bfloat16), w2_ref[...],
                preferred_element_type=jnp.float32) + b2_ref[...],
        0.0)
    logits = jnp.dot(h2.astype(jnp.bfloat16), w3_ref[...],
                     preferred_element_type=jnp.float32) + b3_ref[...]
    # sigmoid(x) = 1 / (1 + exp(-x)); lane-dense f32 store (last dim = 128).
    o_ref[...] = pl.reciprocal(1.0 + jnp.exp(-logits), approx=True).astype(o_ref.dtype)


def init_params(key, input_size, hidden_size):
    # Deterministic init mimicking nn.Linear's U(-1/sqrt(fan_in), 1/sqrt(fan_in)).
    # Weights stored as [in_features, out_features] (transposed vs PyTorch).
    ks = jax.random.split(key, 6)

    def lin(kw, kb, fan_in, fan_out):
        bound = 1.0 / jnp.sqrt(fan_in)
        w = jax.random.uniform(kw, (fan_in, fan_out), jnp.float32, -bound, bound)
        b = jax.random.uniform(kb, (1, fan_out), jnp.float32, -bound, bound)
        return w, b

    w1, b1 = lin(ks[0], ks[1], input_size, hidden_size)
    w2, b2 = lin(ks[2], ks[3], hidden_size, hidden_size)
    w3, b3 = lin(ks[4], ks[5], hidden_size, 1)
    return w1, b1, w2, b2, w3, b3


def pad_params(params, input_size, hidden_size):
    """Zero-pad feature dims to the 128 lane granule and cast weights to bf16.

    Done ONCE at init time (not per forward call)."""
    w1, b1, w2, b2, w3, b3 = params
    kin = _round_up(input_size, LANE)
    h = _round_up(hidden_size, LANE)
    nout = LANE  # lane-dense fc3 output; the real logit lives in column 0

    def pad2(a, r, c):
        out = jnp.zeros((r, c), jnp.float32)
        return out.at[: a.shape[0], : a.shape[1]].set(a)

    w1p = pad2(w1, kin, h).astype(jnp.bfloat16)
    w2p = pad2(w2, h, h).astype(jnp.bfloat16)
    w3p = pad2(w3, h, nout).astype(jnp.bfloat16)
    b1p = pad2(b1, 1, h)       # biases stay f32 (added post-accumulation)
    b2p = pad2(b2, 1, h)
    b3p = pad2(b3, 1, nout)
    return w1p, b1p, w2p, b2p, w3p, b3p


def mlp_forward(x, padded_params, *, tile_b=512):
    """x: (B, input_size) f32. Returns (B, 1) f32 sigmoid output."""
    w1, b1, w2, b2, w3, b3 = padded_params
    B, in_features = x.shape
    kin, h = w1.shape
    nout = w3.shape[1]

    # Batch tile: large enough to pipeline at real batch sizes, rounded to the
    # bf16 sublane granule, small enough to fit comfortably in scoped VMEM on
    # every generation (v7x: 64 MiB physical / 32 MiB default scoped limit).
    tb = min(tile_b, _round_up(B, SUBLANE_BF16))
    b_pad = _round_up(B, tb)

    # Zero-pad x once to (b_pad, kin) and cast to bf16 (MXU-native everywhere).
    xp = jnp.zeros((b_pad, kin), jnp.bfloat16)
    xp = xp.at[:B, :in_features].set(x.astype(jnp.bfloat16))

    flops = 2 * b_pad * (kin * h + h * h + h * nout)
    bytes_accessed = (
        xp.size * 2 + (w1.size + w2.size + w3.size) * 2
        + (b1.size + b2.size + b3.size) * 4 + b_pad * nout * 4)

    out = pl.pallas_call(
        _mlp_kernel,
        out_shape=jax.ShapeDtypeStruct((b_pad, nout), jnp.float32),
        grid=(b_pad // tb,),
        in_specs=[
            pl.BlockSpec((tb, kin), lambda i: (i, 0)),    # x: batch-tiled, pipelined
            pl.BlockSpec((kin, h), lambda i: (0, 0)),     # w1: VMEM-resident
            pl.BlockSpec((1, h), lambda i: (0, 0)),       # b1
            pl.BlockSpec((h, h), lambda i: (0, 0)),       # w2
            pl.BlockSpec((1, h), lambda i: (0, 0)),       # b2
            pl.BlockSpec((h, nout), lambda i: (0, 0)),    # w3
            pl.BlockSpec((1, nout), lambda i: (0, 0)),    # b3
        ],
        out_specs=pl.BlockSpec((tb, nout), lambda i: (i, 0)),
        compiler_params=pltpu.CompilerParams(dimension_semantics=("parallel",)),
        cost_estimate=pl.CostEstimate(
            flops=flops, transcendentals=b_pad * nout, bytes_accessed=bytes_accessed),
    )(xp, w1, b1, w2, b2, w3, b3)

    # Real result: first B rows, column 0 (lane-dense store in-kernel, cheap slice here).
    return out[:B, 0:1]


if __name__ == "__main__":
    input_size, hidden_size, batch = 16, 32, 8

    key = jax.random.PRNGKey(0)
    kx, kp = jax.random.split(key)
    x = jax.random.normal(kx, (batch, input_size), jnp.float32)
    params = init_params(kp, input_size, hidden_size)
    padded = pad_params(params, input_size, hidden_size)

    out = mlp_forward(x, padded)
    out = jax.block_until_ready(out)

    # Reference in plain JAX with the same bf16 operands / f32 accumulation.
    w1, b1, w2, b2, w3, b3 = params
    hh = jnp.maximum(jnp.dot(x.astype(jnp.bfloat16), w1.astype(jnp.bfloat16),
                             preferred_element_type=jnp.float32) + b1, 0.0)
    hh = jnp.maximum(jnp.dot(hh.astype(jnp.bfloat16), w2.astype(jnp.bfloat16),
                             preferred_element_type=jnp.float32) + b2, 0.0)
    logits = jnp.dot(hh.astype(jnp.bfloat16), w3.astype(jnp.bfloat16),
                     preferred_element_type=jnp.float32) + b3
    ref = jax.nn.sigmoid(logits)

    assert out.shape == (batch, 1)
    assert jnp.allclose(out, ref, atol=3e-3), "mismatch vs reference"

    print("KERNEL_OK")
</pallas_src>

<mosaic_0001>
module attributes {stable_mosaic.version = 11 : i64} {
  func.func @_mlp_kernel(%arg0: i32, %arg1: memref<16x128xbf16, #tpu.memory_space<vmem>>, %arg2: memref<128x128xbf16, #tpu.memory_space<vmem>>, %arg3: memref<1x128xf32, #tpu.memory_space<vmem>>, %arg4: memref<128x128xbf16, #tpu.memory_space<vmem>>, %arg5: memref<1x128xf32, #tpu.memory_space<vmem>>, %arg6: memref<128x128xbf16, #tpu.memory_space<vmem>>, %arg7: memref<1x128xf32, #tpu.memory_space<vmem>>, %arg8: memref<16x128xf32, #tpu.memory_space<vmem>>) attributes {dimension_semantics = [#tpu.dimension_semantics<parallel>], iteration_bounds = array<i64: 1>, scalar_prefetch = 0 : i64, scratch_operands = 0 : i64, tpu.core_type = #tpu.core_type<tc>, window_params = [{transform_indices = @transform_0, window_bounds = array<i64: 16, 128>}, {pipeline_mode = #tpu.pipeline_mode<synchronous>, transform_indices = @transform_1, window_bounds = array<i64: 128, 128>}, {pipeline_mode = #tpu.pipeline_mode<synchronous>, transform_indices = @transform_2, window_bounds = array<i64: 1, 128>}, {pipeline_mode = #tpu.pipeline_mode<synchronous>, transform_indices = @transform_3, window_bounds = array<i64: 128, 128>}, {pipeline_mode = #tpu.pipeline_mode<synchronous>, transform_indices = @transform_4, window_bounds = array<i64: 1, 128>}, {pipeline_mode = #tpu.pipeline_mode<synchronous>, transform_indices = @transform_5, window_bounds = array<i64: 128, 128>}, {pipeline_mode = #tpu.pipeline_mode<synchronous>, transform_indices = @transform_6, window_bounds = array<i64: 1, 128>}, {transform_indices = @transform_7, window_bounds = array<i64: 16, 128>}]} {
    %c0 = arith.constant 0 : index
    %c0_0 = arith.constant 0 : index
    %0 = vector.load %arg1[%c0, %c0_0] : memref<16x128xbf16, #tpu.memory_space<vmem>>, vector<16x128xbf16>
    %c0_1 = arith.constant 0 : index
    %c0_2 = arith.constant 0 : index
    %1 = vector.load %arg2[%c0_1, %c0_2] : memref<128x128xbf16, #tpu.memory_space<vmem>>, vector<128x128xbf16>
    %cst = arith.constant dense<0.000000e+00> : vector<16x128xf32>
    %2 = tpu.matmul %0, %1, %cst {dimension_numbers = #tpu.dot_dimension_numbers<[1], [0], [0], [1], [0, 0, 1, 1], [], []>} : vector<16x128xbf16>, vector<128x128xbf16>, vector<16x128xf32> -> vector<16x128xf32>
    %c0_3 = arith.constant 0 : index
    %c0_4 = arith.constant 0 : index
    %3 = vector.load %arg3[%c0_3, %c0_4] : memref<1x128xf32, #tpu.memory_space<vmem>>, vector<1x128xf32>
    %4 = vector.broadcast %3 : vector<1x128xf32> to vector<16x128xf32>
    %5 = arith.addf %2, %4 : vector<16x128xf32>
    %cst_5 = arith.constant 0.000000e+00 : f32
    %6 = vector.broadcast %cst_5 : f32 to vector<16x128xf32>
    %7 = arith.maximumf %5, %6 : vector<16x128xf32>
    %8 = arith.truncf %7 : vector<16x128xf32> to vector<16x128xbf16>
    %c0_6 = arith.constant 0 : index
    %c0_7 = arith.constant 0 : index
    %9 = vector.load %arg4[%c0_6, %c0_7] : memref<128x128xbf16, #tpu.memory_space<vmem>>, vector<128x128xbf16>
    %cst_8 = arith.constant dense<0.000000e+00> : vector<16x128xf32>
    %10 = tpu.matmul %8, %9, %cst_8 {dimension_numbers = #tpu.dot_dimension_numbers<[1], [0], [0], [1], [0, 0, 1, 1], [], []>} : vector<16x128xbf16>, vector<128x128xbf16>, vector<16x128xf32> -> vector<16x128xf32>
    %c0_9 = arith.constant 0 : index
    %c0_10 = arith.constant 0 : index
    %11 = vector.load %arg5[%c0_9, %c0_10] : memref<1x128xf32, #tpu.memory_space<vmem>>, vector<1x128xf32>
    %12 = vector.broadcast %11 : vector<1x128xf32> to vector<16x128xf32>
    %13 = arith.addf %10, %12 : vector<16x128xf32>
    %cst_11 = arith.constant 0.000000e+00 : f32
    %14 = vector.broadcast %cst_11 : f32 to vector<16x128xf32>
    %15 = arith.maximumf %13, %14 : vector<16x128xf32>
    %16 = arith.truncf %15 : vector<16x128xf32> to vector<16x128xbf16>
    %c0_12 = arith.constant 0 : index
    %c0_13 = arith.constant 0 : index
    %17 = vector.load %arg6[%c0_12, %c0_13] : memref<128x128xbf16, #tpu.memory_space<vmem>>, vector<128x128xbf16>
    %cst_14 = arith.constant dense<0.000000e+00> : vector<16x128xf32>
    %18 = tpu.matmul %16, %17, %cst_14 {dimension_numbers = #tpu.dot_dimension_numbers<[1], [0], [0], [1], [0, 0, 1, 1], [], []>} : vector<16x128xbf16>, vector<128x128xbf16>, vector<16x128xf32> -> vector<16x128xf32>
    %c0_15 = arith.constant 0 : index
    %c0_16 = arith.constant 0 : index
    %19 = vector.load %arg7[%c0_15, %c0_16] : memref<1x128xf32, #tpu.memory_space<vmem>>, vector<1x128xf32>
    %20 = vector.broadcast %19 : vector<1x128xf32> to vector<16x128xf32>
    %21 = arith.addf %18, %20 : vector<16x128xf32>
    %cst_17 = arith.constant 0.000000e+00 : f32
    %22 = vector.broadcast %cst_17 : f32 to vector<16x128xf32>
    %23 = arith.subf %22, %21 : vector<16x128xf32>
    %24 = math.exp %23 : vector<16x128xf32>
    %cst_18 = arith.constant 1.000000e+00 : f32
    %25 = vector.broadcast %cst_18 : f32 to vector<16x128xf32>
    %26 = arith.addf %25, %24 : vector<16x128xf32>
    %27 = tpu.reciprocal %26 {approx = true} : vector<16x128xf32> -> vector<16x128xf32>
    %c0_19 = arith.constant 0 : index
    %c0_20 = arith.constant 0 : index
    %28 = vector.load %arg8[%c0_19, %c0_20] : memref<16x128xf32, #tpu.memory_space<vmem>>, vector<16x128xf32>
    tpu.vector_store %arg8[%c0_19, %c0_20], %27 {strides = array<i32>} : memref<16x128xf32, #tpu.memory_space<vmem>>, vector<16x128xf32>,
    return
  }
  func.func @transform_0(%arg0: i32) -> (i32, i32) {
    %c0_i32 = arith.constant 0 : i32
    %c0_i32_0 = arith.constant 0 : i32
    return %arg0, %c0_i32 : i32, i32
  }
  func.func @transform_1(%arg0: i32) -> (i32, i32) {
    %c0_i32 = arith.constant 0 : i32
    %c0_i32_0 = arith.constant 0 : i32
    %c0_i32_1 = arith.constant 0 : i32
    return %c0_i32, %c0_i32_0 : i32, i32
  }
  func.func @transform_2(%arg0: i32) -> (i32, i32) {
    %c0_i32 = arith.constant 0 : i32
    %c0_i32_0 = arith.constant 0 : i32
    %c0_i32_1 = arith.constant 0 : i32
    return %c0_i32, %c0_i32_0 : i32, i32
  }
  func.func @transform_3(%arg0: i32) -> (i32, i32) {
    %c0_i32 = arith.constant 0 : i32
    %c0_i32_0 = arith.constant 0 : i32
    %c0_i32_1 = arith.constant 0 : i32
    return %c0_i32, %c0_i32_0 : i32, i32
  }
  func.func @transform_4(%arg0: i32) -> (i32, i32) {
    %c0_i32 = arith.constant 0 : i32
    %c0_i32_0 = arith.constant 0 : i32
    %c0_i32_1 = arith.constant 0 : i32
    return %c0_i32, %c0_i32_0 : i32, i32
  }
  func.func @transform_5(%arg0: i32) -> (i32, i32) {
    %c0_i32 = arith.constant 0 : i32
    %c0_i32_0 = arith.constant 0 : i32
    %c0_i32_1 = arith.constant 0 : i32
    return %c0_i32, %c0_i32_0 : i32, i32
  }
  func.func @transform_6(%arg0: i32) -> (i32, i32) {
    %c0_i32 = arith.constant 0 : i32
    %c0_i32_0 = arith.constant 0 : i32
    %c0_i32_1 = arith.constant 0 : i32
    return %c0_i32, %c0_i32_0 : i32, i32
  }
  func.func @transform_7(%arg0: i32) -> (i32, i32) {
    %c0_i32 = arith.constant 0 : i32
    %c0_i32_0 = arith.constant 0 : i32
    return %arg0, %c0_i32 : i32, i32
  }
}

</mosaic_0001>

<bundles_post_ra>
// kernel: tpu_custom_call.1
= control target key start
LH: loop header
LB: loop body
LE: loop exit
PB: predicated region body
PF: predicated region fallthrough
CT: control target
= control target key end

     0   :  { %12 = vsyncpa [#allocation3], 0  ;;  %s729_s0 = inlined_call_operand.hbm [shape: bf16[16,128], index: 0, kind: input, shape index: {}]   ;;  %s730_s1 = inlined_call_operand.hbm [shape: bf16[128,128], index: 1, kind: input, shape index: {}]   ;;  %s731_s2 = inlined_call_operand.vmem [shape: f32[1,128], index: 2, kind: input, shape index: {}]   ;;  %s732_s3 = inlined_call_operand.hbm [shape: bf16[128,128], index: 3, kind: input, shape index: {}]   ;;  %s733_s4 = inlined_call_operand.vmem [shape: f32[1,128], index: 4, kind: input, shape index: {}]   ;;  %s734_s5 = inlined_call_operand.hbm [shape: bf16[128,128], index: 5, kind: input, shape index: {}]   ;;  %s735_s6 = inlined_call_operand.vmem [shape: f32[1,128], index: 6, kind: input, shape index: {}]   ;;  %s736_s7 = inlined_call_operand.hbm [shape: f32[16,128], index: 7, kind: output, shape index: {}]  }
   0x1   :  { %13 = vsyncpa [#allocation6], 0 }
   0x2   :  { %14 = vsyncpa [#allocation9], 0 }
   0x3   :  { %15 = vsyncpa [#allocation4], 0  ;;  %s33_s26 = sshll.u32 %s730_s1, 4  ;;  %s656_s27 = smov [#allocation5]   ;;  %s34_s26 = int_to_ptr.hbm [resolvable:$true] %s33_s26 }
   0x4   :  { %s35_s28 = sshll.u32 %s656_s27, 4  ;;  %s20_s8 = sshll.u32 %s729_s0, 4  ;;  %s36_s28 = int_to_ptr.vmem [resolvable:$true] %s35_s28  ;;  %s21_s8 = int_to_ptr.hbm [resolvable:$true] %s20_s8 }
   0x5   :  { %s657_s9 = smov 64   ;;  %s658_s10 = smov 4  }
   0x6   :  { %41 = dma.hbm_to_vmem [thread:$0]  %s34_s26, 1024, %s36_s28, [#allocation6], %s657_s9, %s657_s9, %s658_s10  }
   0x7   :  { %s659_s11 = smov [#allocation2]   ;;  %s48_s15 = sshll.u32 %s732_s3, 4  ;;  %s49_s15 = int_to_ptr.hbm [resolvable:$true] %s48_s15 }
   0x8   :  { %s22_s12 = sshll.u32 %s659_s11, 4  ;;  %s63_s17 = sshll.u32 %s734_s5, 4  ;;  %s23_s12 = int_to_ptr.vmem [resolvable:$true] %s22_s12  ;;  %s64_s17 = int_to_ptr.hbm [resolvable:$true] %s63_s17 }
   0x9   :  { %28 = dma.hbm_to_vmem [thread:$0]  %s21_s8, 128, %s23_s12, [#allocation3], %s657_s9, %s657_s9, %s658_s10  }
   0xa   :  { %s660_s18 = smov [#allocation7]   ;;  %s661_s0 = smov [#allocation8]  }
   0xb   :  { %s50_s19 = sshll.u32 %s660_s18, 4  ;;  %s65_s20 = sshll.u32 %s661_s0, 4  ;;  %s51_s19 = int_to_ptr.vmem [resolvable:$true] %s50_s19  ;;  %s66_s20 = int_to_ptr.vmem [resolvable:$true] %s65_s20 }
   0xc   :  { %56 = dma.hbm_to_vmem [thread:$0]  %s49_s15, 1024, %s51_s19, [#allocation6], %s657_s9, %s657_s9, %s658_s10  }
   0xd   :  { %71 = dma.hbm_to_vmem [thread:$0]  %s64_s17, 1024, %s66_s20, [#allocation9], %s657_s9, %s657_s9, %s658_s10  }
   0xe   :  { %648 = dma.done.wait [#allocation3], 128  }
   0xf   :  { %649 = vsyncadd [#allocation3], 4294967168 }
  0x10   :  { %650 = dma.done.wait [#allocation6], 2048  }
  0x11   :  { %651 = vsyncadd [#allocation6], 4294965248 }
  0x12   :  { %652 = dma.done.wait [#allocation9], 1024  }
  0x13   :  { %653 = vsyncadd [#allocation9], 4294966272  ;;  %v491_v0 = vld [vmem:[#allocation5 + $0x38] sm:$0xff]  ;;  %v490_v1 = vld [vmem:[#allocation5 + $0x30] sm:$0xff]  ;;  %s368_s26 = sshll.u32 %s736_s7, 4  ;;  %s663_s27 = smov 128   ;;  %s369_s26 = int_to_ptr.hbm [resolvable:$true] %s368_s26 }
  0x14   :  { %166 = vmatpush.bf16.msra.mxu0 %v491_v0  ;;  %v499_v2 = vld [vmem:[#allocation7 + $0x38] sm:$0xff]  ;;  %v498_v3 = vld [vmem:[#allocation7 + $0x30] sm:$0xff]  ;;  %v489_v4 = vld [vmem:[#allocation5 + $0x28] sm:$0xff]  ;;  %s664_s28 = smov 8  }
  0x15   :  { %251 = vmatpush.bf16.msra.mxu1 %v499_v2  ;;  %v497_v5 = vld [vmem:[#allocation7 + $0x28] sm:$0xff]  ;;  %v488_v6 = vld [vmem:[#allocation5 + $0x20] sm:$0xff]  ;;  %v487_v8 = vld [vmem:[#allocation5 + $0x18] sm:$0xff] }
  0x16   :  { %v496_v7 = vld [vmem:[#allocation7 + $0x20] sm:$0xff]  ;;  %v486_v9 = vld [vmem:[#allocation5 + $0x10] sm:$0xff]  ;;  %v485_v10 = vld [vmem:[#allocation5 + $0x8] sm:$0xff] }
  0x17   :  { %v484_v11 = vld [vmem:[#allocation5] sm:$0xff]  ;;  %v483_v12 = vld [vmem:[#allocation2] sm:$0xff]  ;;  %v494_v14 = vld [vmem:[#allocation7 + $0x10] sm:$0xff] }
  0x18   :  { %167 = vmatpush.bf16.msra.mxu0 %v490_v1  ;;  %v495_v13 = vld [vmem:[#allocation7 + $0x18] sm:$0xff]  ;;  %v493_v15 = vld [vmem:[#allocation7 + $0x8] sm:$0xff]  ;;  %v492_v16 = vld [vmem:[#allocation7] sm:$0xff] }
  0x19   :  { %252 = vmatpush.bf16.msra.mxu1 %v498_v3  ;;  %v507_v17 = vld [vmem:[#allocation8 + $0x38] sm:$0xff]  ;;  %v506_v18 = vld [vmem:[#allocation8 + $0x30] sm:$0xff]  ;;  %v505_v19 = vld [vmem:[#allocation8 + $0x28] sm:$0xff] }
  0x1a   :  { %336 = vmatpush.bf16.msra.mxu2 %v507_v17  ;;  %v504_v20 = vld [vmem:[#allocation8 + $0x20] sm:$0xff]  ;;  %v517_v22 = vld [vmem:[%s731_s2] ss:$0 sm:$0xff]  ;;  %v502_v30 = vld [vmem:[#allocation8 + $0x10] sm:$0xff] }
  0x1b   :  { %v503_v29 = vld [vmem:[#allocation8 + $0x18] sm:$0xff]  ;;  %v501_v31 = vld [vmem:[#allocation8 + $0x8] sm:$0xff]  ;;  %v500_v32 = vld [vmem:[#allocation8] sm:$0xff] }
  0x1c   :  { %168 = vmatpush.bf16.msra.mxu0 %v489_v4  ;;  %v518_v34 = vld [vmem:[%s733_s4] ss:$0 sm:$0xff]  ;;  %s662_s4 = smov [#allocation10]  }
  0x1d   :  { %253 = vmatpush.bf16.msra.mxu1 %v497_v5  ;;  %v519_v41 = vld [vmem:[%s735_s6] ss:$0 sm:$0xff]  ;;  %s366_s6 = sshll.u32 %s662_s4, 4  ;;  %s367_s6 = int_to_ptr.vmem [resolvable:$true] %s366_s6 }
  0x1e   :  { %337 = vmatpush.bf16.msra.mxu2 %v506_v18 }
  0x20   :  { %169 = vmatpush.bf16.msra.mxu0 %v488_v6 }
  0x21   :  { %254 = vmatpush.bf16.msra.mxu1 %v496_v7 }
  0x22   :  { %338 = vmatpush.bf16.msra.mxu2 %v505_v19 }
  0x24   :  { %170 = vmatpush.bf16.msra.mxu0 %v487_v8 }
  0x25   :  { %255 = vmatpush.bf16.msra.mxu1 %v495_v13 }
  0x26   :  { %339 = vmatpush.bf16.msra.mxu2 %v504_v20 }
  0x28   :  { %171 = vmatpush.bf16.msra.mxu0 %v486_v9 }
  0x29   :  { %256 = vmatpush.bf16.msra.mxu1 %v494_v14 }
  0x2a   :  { %340 = vmatpush.bf16.msra.mxu2 %v503_v29 }
  0x2c   :  { %172 = vmatpush.bf16.msra.mxu0 %v485_v10 }
  0x2d   :  { %257 = vmatpush.bf16.msra.mxu1 %v493_v15 }
  0x2e   :  { %341 = vmatpush.bf16.msra.mxu2 %v502_v30 }
  0x30   :  { %173 = vmatpush.bf16.msra.mxu0 %v484_v11 }
  0x31   :  { %258 = vmatpush.bf16.msra.mxu1 %v492_v16 }
  0x32   :  { %342 = vmatpush.bf16.msra.mxu2 %v501_v31 }
  0x33   :  { %174 = vmatmul.bf16.vlgmr.msra.gmra.mxu0 %v483_v12 }
  0x36   :  { %343 = vmatpush.bf16.msra.mxu2 %v500_v32 }
  0xb0   :  { %v175_v21 = vpop.f32.mrf.mxu0 }
  0xb1   :  { %v176_v23 = vadd.f32 %v517_v22, %v175_v21 }
  0xb3   :  { %v180_v26 = vmax.f32 %v176_v23, 0.0 }
  0xb8   :  { %v177_v24 = vpop.f32.mrf.mxu0 }
  0xb9   :  { %v178_v25 = vadd.f32 %v517_v22, %v177_v24 }
  0xbb   :  { %v181_v27 = vmax.f32 %v178_v25, 0.0 }
  0xbd   :  { %v182_v28 = vpack.c.bf16 %v181_v27, %v180_v26 }
  0xbf   :  { %259 = vmatmul.bf16.vlgmr.msra.gmra.mxu1 %v182_v28 }
 0x13c   :  { %v260_v33 = vpop.f32.mrf.mxu1 }
 0x13d   :  { %v261_v35 = vadd.f32 %v518_v34, %v260_v33 }
 0x13f   :  { %v265_v38 = vmax.f32 %v261_v35, 0.0 }
 0x144   :  { %v262_v36 = vpop.f32.mrf.mxu1 }
 0x145   :  { %v263_v37 = vadd.f32 %v518_v34, %v262_v36 }
 0x147   :  { %v266_v39 = vmax.f32 %v263_v37, 0.0 }
 0x149   :  { %v267_v40 = vpack.c.bf16 %v266_v39, %v265_v38 }
 0x14b   :  { %344 = vmatmul.bf16.vlgmr.msra.gmra.mxu2 %v267_v40 }
 0x1ce   :  { %v345_v42 = vpop.f32.mrf.mxu2 }
 0x1cf   :  { %v346_v43 = vadd.f32 %v519_v41, %v345_v42 }
 0x1d1   :  { %v350_v44 = vsub.f32 0.0, %v346_v43 }
 0x1d3   :  { %v352_v45 = vmul.f32 1.442695, %v350_v44 }
 0x1d5   :  { %520 = vpow2.f32 %v352_v45 }
 0x1d6   :  { %v347_v46 = vpop.f32.mrf.mxu2 }
 0x1d7   :  { %v348_v47 = vadd.f32 %v519_v41, %v347_v46 }
 0x1d9   :  { %v351_v48 = vsub.f32 0.0, %v348_v47 }
 0x1db   :  { %v521_v49 = vpop.eup %520  ;;  %v354_v50 = vmul.f32 1.442695, %v351_v48 }
 0x1dc   :  { %v356_v51 = vadd.f32 1.0, %v521_v49 }
 0x1dd   :  { %522 = vpow2.f32 %v354_v50 }
 0x1de   :  { %524 = vrcp.f32 %v356_v51 }
 0x1e3   :  { %v523_v52 = vpop.eup %522 }
 0x1e4   :  { %v525_v53 = vpop.eup %524  ;;  %v357_v54 = vadd.f32 1.0, %v523_v52 }
 0x1e5   :  { %360 = vst [vmem:[#allocation10] sm:$0xff] %v525_v53 }
 0x1e6   :  { %526 = vrcp.f32 %v357_v54 }
 0x1ec   :  { %v527_v55 = vpop.eup %526 }
 0x1ed   :  { %361 = vst [vmem:[#allocation10 + $0x8] sm:$0xff] %v527_v55 }
 0x1ee   :  { %374 = dma.vmem_to_hbm [thread:$0]  %s367_s6, 256, %s369_s26, [#allocation4], %s663_s27, %s663_s27, %s664_s28  }
 0x1ef   :  { %654 = dma.done.wait [#allocation4], 256  }
 0x1f0   :  { %655 = vsyncadd [#allocation4], 4294967040 }
 0x1f1   :  { %379 = vsyncpa [#allocation3], 1 }
 0x1f2   :  { %380 = vsyncpa [#allocation6], 1 }
 0x1f3   :  { %381 = vsyncpa [#allocation9], 1 }
 0x1f4   :  { %382 = vsyncpa [#allocation4], 1 }

</bundles_post_ra>
